<compile_context>
chip_gen: v5e
topology: v5e:2x2
jax: 0.10.0
libtpu: 0.0.40
codegen_flags: <defaults>
</compile_context>

<pallas_src>
import jax
import jax.numpy as jnp
from jax.experimental import pallas as pl
from jax.experimental.pallas import tpu as pltpu

BN_EPS = 1e-5


def _round_up(n, m):
    return ((n + m - 1) // m) * m


def fc_model_kernel(x_ref, w1_ref, b1_ref, gamma_ref, beta_ref,
                    wo_ref, bo_ref, o_ref, acc_ref):
    k = pl.program_id(0)

    @pl.when(k == 0)
    def _():
        acc_ref[...] = jnp.zeros_like(acc_ref)

    # ---- f1 (hidden tile): [B, Fp] @ [Fp, tH] on the MXU, f32 accumulate ----
    h = jnp.dot(x_ref[...], w1_ref[...], preferred_element_type=jnp.float32)
    h = h + b1_ref[...]
    # ---- ReLU ----
    h = jnp.maximum(h, 0.0)

    # ---- bn1: BatchNorm1d, training-mode batch statistics over full batch ----
    # (batch axis is never tiled, so stats are exact per hidden tile)
    mean = jnp.mean(h, axis=0, keepdims=True)
    centered = h - mean
    var = jnp.mean(centered * centered, axis=0, keepdims=True)  # biased variance
    # Fold normalize + affine into a single per-element FMA.
    scale = jax.lax.rsqrt(var + BN_EPS) * gamma_ref[...]
    h_norm = centered * scale + beta_ref[...]

    # ---- fout partial product: K-reduction over hidden tiles ----
    acc_ref[...] += jnp.dot(h_norm.astype(wo_ref.dtype), wo_ref[...],
                            preferred_element_type=jnp.float32)

    @pl.when(k == pl.num_programs(0) - 1)
    def _():
        logits = acc_ref[...] + bo_ref[...]
        # sigmoid(x) == 0.5*(tanh(0.5*x)+1): single EUP op, keeps VALU free.
        o_ref[...] = 0.5 * (jnp.tanh(0.5 * logits) + 1.0)


def fc_model_forward(x, params, *, compute_dtype=jnp.bfloat16, hidden_tile=512):
    """Forward pass. compute_dtype controls MXU operand dtype (bf16 default)."""
    B, F = x.shape
    H = params["w1"].shape[1]
    O = params["wo"].shape[1]
    f32 = jnp.float32

    # Pad feature dims to lane multiples (128). Batch is NOT padded: BN stats
    # must be taken over exactly the real batch rows.
    Fp = _round_up(F, 128)
    Hp = _round_up(H, 128)
    Op = _round_up(O, 128)

    # Hidden tile: largest multiple of 128 <= hidden_tile that divides Hp.
    tH = min(_round_up(min(hidden_tile, Hp), 128), Hp)
    while Hp % tH != 0:
        tH -= 128

    # Zero-padding keeps the math exact: padded input/hidden/output columns
    # contribute 0 to every matmul, and padded hidden features normalize to
    # beta_pad = 0 before hitting zero rows of wo.
    x_p = jnp.zeros((B, Fp), f32).at[:, :F].set(x.astype(f32))
    w1_p = jnp.zeros((Fp, Hp), f32).at[:F, :H].set(params["w1"])
    b1_p = jnp.zeros((1, Hp), f32).at[:, :H].set(params["b1"])
    gamma_p = jnp.zeros((1, Hp), f32).at[:, :H].set(params["gamma"])
    beta_p = jnp.zeros((1, Hp), f32).at[:, :H].set(params["beta"])
    wo_p = jnp.zeros((Hp, Op), f32).at[:H, :O].set(params["wo"])
    bo_p = jnp.zeros((1, Op), f32).at[:, :O].set(params["bo"])

    # MXU operands in compute_dtype (bf16 halves weight HBM/VMEM traffic);
    # biases / BN params / stats stay f32.
    x_c = x_p.astype(compute_dtype)
    w1_c = w1_p.astype(compute_dtype)
    wo_c = wo_p.astype(compute_dtype)

    itemsize = jnp.dtype(compute_dtype).itemsize
    cost = pl.CostEstimate(
        flops=2 * B * Fp * Hp + 2 * B * Hp * Op + 8 * B * Hp,
        transcendentals=B * Op + Hp,
        bytes_accessed=(B * Fp + Fp * Hp + Hp * Op) * itemsize
                       + (3 * Hp + Op) * 4 + B * Op * 4,
    )

    # NOTE: x and w1 are tiled only along hidden; for very large input_size a
    # second reduction axis over F would be the next step.
    grid = (Hp // tH,)
    out_padded = pl.pallas_call(
        fc_model_kernel,
        out_shape=jax.ShapeDtypeStruct((B, Op), jnp.float32),
        grid_spec=pltpu.PrefetchScalarGridSpec(
            num_scalar_prefetch=0,
            grid=grid,
            in_specs=[
                pl.BlockSpec((B, Fp), lambda k: (0, 0)),    # x (resident)
                pl.BlockSpec((Fp, tH), lambda k: (0, k)),   # w1 column tile
                pl.BlockSpec((1, tH), lambda k: (0, k)),    # b1
                pl.BlockSpec((1, tH), lambda k: (0, k)),    # gamma
                pl.BlockSpec((1, tH), lambda k: (0, k)),    # beta
                pl.BlockSpec((tH, Op), lambda k: (k, 0)),   # wo row tile
                pl.BlockSpec((1, Op), lambda k: (0, 0)),    # bo
            ],
            out_specs=pl.BlockSpec((B, Op), lambda k: (0, 0)),
            scratch_shapes=[pltpu.VMEM((B, Op), jnp.float32)],
        ),
        compiler_params=pltpu.CompilerParams(
            dimension_semantics=("arbitrary",),            # hidden = reduction axis
            vmem_limit_bytes=48 * 1024 * 1024,             # fits v7x's 64 MiB VMEM
        ),
        cost_estimate=cost,
    )(x_c, w1_c, b1_p, gamma_p, beta_p, wo_c, bo_p)

    return out_padded[:, :O]


def init_params(key, input_size, hidden_size, output_size):
    k1, k2, k3, k4 = jax.random.split(key, 4)
    # Deterministic, PyTorch-Linear-like scale (uniform in +-1/sqrt(fan_in)).
    bound1 = 1.0 / jnp.sqrt(jnp.float32(input_size))
    boundo = 1.0 / jnp.sqrt(jnp.float32(hidden_size))
    return {
        "w1": jax.random.uniform(k1, (input_size, hidden_size), jnp.float32,
                                 -bound1, bound1),
        "b1": jax.random.uniform(k2, (1, hidden_size), jnp.float32,
                                 -bound1, bound1),
        # BatchNorm1d affine params: gamma=1, beta=0 (PyTorch default init).
        "gamma": jnp.ones((1, hidden_size), jnp.float32),
        "beta": jnp.zeros((1, hidden_size), jnp.float32),
        "wo": jax.random.uniform(k3, (hidden_size, output_size), jnp.float32,
                                 -boundo, boundo),
        "bo": jax.random.uniform(k4, (1, output_size), jnp.float32,
                                 -boundo, boundo),
    }


def reference_forward(x, params):
    h = x @ params["w1"] + params["b1"]
    h = jnp.maximum(h, 0.0)
    mean = jnp.mean(h, axis=0, keepdims=True)
    var = jnp.mean((h - mean) ** 2, axis=0, keepdims=True)
    h = (h - mean) / jnp.sqrt(var + BN_EPS)
    h = h * params["gamma"] + params["beta"]
    logits = h @ params["wo"] + params["bo"]
    return jax.nn.sigmoid(logits)


if __name__ == "__main__":
    batch = 8
    input_size = 16
    hidden_size = 32
    output_size = 4

    key = jax.random.PRNGKey(0)
    kx, kp = jax.random.split(key)
    x = jax.random.normal(kx, (batch, input_size), jnp.float32)
    params = init_params(kp, input_size, hidden_size, output_size)

    ref = reference_forward(x, params)

    # Strict numerical check with f32 MXU operands.
    out_f32 = jax.block_until_ready(
        fc_model_forward(x, params, compute_dtype=jnp.float32))
    assert out_f32.shape == (batch, output_size)
    assert jnp.allclose(out_f32, ref, atol=1e-5, rtol=1e-5)

    # Fast path: bf16 MXU operands (default), f32 stats/epilogue.
    out_bf16 = jax.block_until_ready(fc_model_forward(x, params))
    assert out_bf16.shape == (batch, output_size)
    assert jnp.allclose(out_bf16, ref, atol=2e-2, rtol=2e-2)

    print("KERNEL_OK")
</pallas_src>

<mosaic_0001>
module attributes {stable_mosaic.version = 11 : i64} {
  func.func @fc_model_kernel(%arg0: i32, %arg1: memref<8x128xf32, #tpu.memory_space<vmem>>, %arg2: memref<128x128xf32, #tpu.memory_space<vmem>>, %arg3: memref<1x128xf32, #tpu.memory_space<vmem>>, %arg4: memref<1x128xf32, #tpu.memory_space<vmem>>, %arg5: memref<1x128xf32, #tpu.memory_space<vmem>>, %arg6: memref<128x128xf32, #tpu.memory_space<vmem>>, %arg7: memref<1x128xf32, #tpu.memory_space<vmem>>, %arg8: memref<8x128xf32, #tpu.memory_space<vmem>>, %arg9: memref<8x128xf32, #tpu.memory_space<vmem>>) attributes {dimension_semantics = [#tpu.dimension_semantics<arbitrary>], iteration_bounds = array<i64: 1>, scalar_prefetch = 0 : i64, scratch_operands = 1 : i64, tpu.core_type = #tpu.core_type<tc>, window_params = [{pipeline_mode = #tpu.pipeline_mode<synchronous>, transform_indices = @transform_0, window_bounds = array<i64: 8, 128>}, {transform_indices = @transform_1, window_bounds = array<i64: 128, 128>}, {transform_indices = @transform_2, window_bounds = array<i64: 1, 128>}, {transform_indices = @transform_3, window_bounds = array<i64: 1, 128>}, {transform_indices = @transform_4, window_bounds = array<i64: 1, 128>}, {transform_indices = @transform_5, window_bounds = array<i64: 128, 128>}, {pipeline_mode = #tpu.pipeline_mode<synchronous>, transform_indices = @transform_6, window_bounds = array<i64: 1, 128>}, {pipeline_mode = #tpu.pipeline_mode<synchronous>, transform_indices = @transform_7, window_bounds = array<i64: 8, 128>}]} {
    %c0_i32 = arith.constant 0 : i32
    %0 = arith.cmpi eq, %arg0, %c0_i32 : i32
    %1 = arith.extui %0 : i1 to i32
    %c0_i32_0 = arith.constant 0 : i32
    %2 = arith.cmpi ne, %1, %c0_i32_0 : i32
    scf.if %2 {
      %cst_25 = arith.constant 0.000000e+00 : f32
      %40 = vector.broadcast %cst_25 : f32 to vector<8x128xf32>
      %c0_26 = arith.constant 0 : index
      %c0_27 = arith.constant 0 : index
      %41 = vector.load %arg9[%c0_26, %c0_27] : memref<8x128xf32, #tpu.memory_space<vmem>>, vector<8x128xf32>
      tpu.vector_store %arg9[%c0_26, %c0_27], %40 {strides = array<i32>} : memref<8x128xf32, #tpu.memory_space<vmem>>, vector<8x128xf32>,
    } else {
    }
    %c0 = arith.constant 0 : index
    %c0_1 = arith.constant 0 : index
    %3 = vector.load %arg1[%c0, %c0_1] : memref<8x128xf32, #tpu.memory_space<vmem>>, vector<8x128xf32>
    %c0_2 = arith.constant 0 : index
    %c0_3 = arith.constant 0 : index
    %4 = vector.load %arg2[%c0_2, %c0_3] : memref<128x128xf32, #tpu.memory_space<vmem>>, vector<128x128xf32>
    %cst = arith.constant dense<0.000000e+00> : vector<8x128xf32>
    %5 = tpu.matmul %3, %4, %cst {dimension_numbers = #tpu.dot_dimension_numbers<[1], [0], [0], [1], [0, 0, 1, 1], [], []>} : vector<8x128xf32>, vector<128x128xf32>, vector<8x128xf32> -> vector<8x128xf32>
    %c0_4 = arith.constant 0 : index
    %c0_5 = arith.constant 0 : index
    %6 = vector.load %arg3[%c0_4, %c0_5] : memref<1x128xf32, #tpu.memory_space<vmem>>, vector<1x128xf32>
    %7 = vector.broadcast %6 : vector<1x128xf32> to vector<8x128xf32>
    %8 = arith.addf %5, %7 : vector<8x128xf32>
    %cst_6 = arith.constant 0.000000e+00 : f32
    %9 = vector.broadcast %cst_6 : f32 to vector<8x128xf32>
    %10 = arith.maximumf %8, %9 : vector<8x128xf32>
    %cst_7 = arith.constant dense<0.000000e+00> : vector<128xf32>
    %11 = vector.multi_reduction <add>, %10, %cst_7 [0] : vector<8x128xf32> to vector<128xf32>
    %12 = vector.shape_cast %11 : vector<128xf32> to vector<1x128xf32>
    %cst_8 = arith.constant 8.000000e+00 : f32
    %13 = vector.broadcast %cst_8 : f32 to vector<1x128xf32>
    %14 = arith.divf %12, %13 : vector<1x128xf32>
    %15 = vector.broadcast %14 : vector<1x128xf32> to vector<8x128xf32>
    %16 = arith.subf %10, %15 : vector<8x128xf32>
    %17 = arith.mulf %16, %16 : vector<8x128xf32>
    %cst_9 = arith.constant dense<0.000000e+00> : vector<128xf32>
    %18 = vector.multi_reduction <add>, %17, %cst_9 [0] : vector<8x128xf32> to vector<128xf32>
    %19 = vector.shape_cast %18 : vector<128xf32> to vector<1x128xf32>
    %cst_10 = arith.constant 8.000000e+00 : f32
    %20 = vector.broadcast %cst_10 : f32 to vector<1x128xf32>
    %21 = arith.divf %19, %20 : vector<1x128xf32>
    %cst_11 = arith.constant 9.99999974E-6 : f32
    %22 = vector.broadcast %cst_11 : f32 to vector<1x128xf32>
    %23 = arith.addf %21, %22 : vector<1x128xf32>
    %24 = math.rsqrt %23 : vector<1x128xf32>
    %c0_12 = arith.constant 0 : index
    %c0_13 = arith.constant 0 : index
    %25 = vector.load %arg4[%c0_12, %c0_13] : memref<1x128xf32, #tpu.memory_space<vmem>>, vector<1x128xf32>
    %26 = arith.mulf %24, %25 : vector<1x128xf32>
    %27 = vector.broadcast %26 : vector<1x128xf32> to vector<8x128xf32>
    %28 = arith.mulf %16, %27 : vector<8x128xf32>
    %c0_14 = arith.constant 0 : index
    %c0_15 = arith.constant 0 : index
    %29 = vector.load %arg5[%c0_14, %c0_15] : memref<1x128xf32, #tpu.memory_space<vmem>>, vector<1x128xf32>
    %30 = vector.broadcast %29 : vector<1x128xf32> to vector<8x128xf32>
    %31 = arith.addf %28, %30 : vector<8x128xf32>
    %c0_16 = arith.constant 0 : index
    %c0_17 = arith.constant 0 : index
    %32 = vector.load %arg9[%c0_16, %c0_17] : memref<8x128xf32, #tpu.memory_space<vmem>>, vector<8x128xf32>
    %c0_18 = arith.constant 0 : index
    %c0_19 = arith.constant 0 : index
    %33 = vector.load %arg6[%c0_18, %c0_19] : memref<128x128xf32, #tpu.memory_space<vmem>>, vector<128x128xf32>
    %cst_20 = arith.constant dense<0.000000e+00> : vector<8x128xf32>
    %34 = tpu.matmul %31, %33, %cst_20 {dimension_numbers = #tpu.dot_dimension_numbers<[1], [0], [0], [1], [0, 0, 1, 1], [], []>} : vector<8x128xf32>, vector<128x128xf32>, vector<8x128xf32> -> vector<8x128xf32>
    %35 = arith.addf %32, %34 : vector<8x128xf32>
    %c0_21 = arith.constant 0 : index
    %c0_22 = arith.constant 0 : index
    %36 = vector.load %arg9[%c0_21, %c0_22] : memref<8x128xf32, #tpu.memory_space<vmem>>, vector<8x128xf32>
    tpu.vector_store %arg9[%c0_21, %c0_22], %35 {strides = array<i32>} : memref<8x128xf32, #tpu.memory_space<vmem>>, vector<8x128xf32>,
    %c0_i32_23 = arith.constant 0 : i32
    %37 = arith.cmpi eq, %arg0, %c0_i32_23 : i32
    %38 = arith.extui %37 : i1 to i32
    %c0_i32_24 = arith.constant 0 : i32
    %39 = arith.cmpi ne, %38, %c0_i32_24 : i32
    scf.if %39 {
      %c0_25 = arith.constant 0 : index
      %c0_26 = arith.constant 0 : index
      %40 = vector.load %arg9[%c0_25, %c0_26] : memref<8x128xf32, #tpu.memory_space<vmem>>, vector<8x128xf32>
      %c0_27 = arith.constant 0 : index
      %c0_28 = arith.constant 0 : index
      %41 = vector.load %arg7[%c0_27, %c0_28] : memref<1x128xf32, #tpu.memory_space<vmem>>, vector<1x128xf32>
      %42 = vector.broadcast %41 : vector<1x128xf32> to vector<8x128xf32>
      %43 = arith.addf %40, %42 : vector<8x128xf32>
      %cst_29 = arith.constant 5.000000e-01 : f32
      %44 = vector.broadcast %cst_29 : f32 to vector<8x128xf32>
      %45 = arith.mulf %44, %43 : vector<8x128xf32>
      %46 = math.tanh %45 : vector<8x128xf32>
      %cst_30 = arith.constant 1.000000e+00 : f32
      %47 = vector.broadcast %cst_30 : f32 to vector<8x128xf32>
      %48 = arith.addf %46, %47 : vector<8x128xf32>
      %cst_31 = arith.constant 5.000000e-01 : f32
      %49 = vector.broadcast %cst_31 : f32 to vector<8x128xf32>
      %50 = arith.mulf %49, %48 : vector<8x128xf32>
      %c0_32 = arith.constant 0 : index
      %c0_33 = arith.constant 0 : index
      %51 = vector.load %arg8[%c0_32, %c0_33] : memref<8x128xf32, #tpu.memory_space<vmem>>, vector<8x128xf32>
      tpu.vector_store %arg8[%c0_32, %c0_33], %50 {strides = array<i32>} : memref<8x128xf32, #tpu.memory_space<vmem>>, vector<8x128xf32>,
    } else {
    }
    return
  }
  func.func @transform_0(%arg0: i32) -> (i32, i32) {
    %c0_i32 = arith.constant 0 : i32
    %c0_i32_0 = arith.constant 0 : i32
    %c0_i32_1 = arith.constant 0 : i32
    return %c0_i32, %c0_i32_0 : i32, i32
  }
  func.func @transform_1(%arg0: i32) -> (i32, i32) {
    %c0_i32 = arith.constant 0 : i32
    %c0_i32_0 = arith.constant 0 : i32
    return %c0_i32, %arg0 : i32, i32
  }
  func.func @transform_2(%arg0: i32) -> (i32, i32) {
    %c0_i32 = arith.constant 0 : i32
    %c0_i32_0 = arith.constant 0 : i32
    return %c0_i32, %arg0 : i32, i32
  }
  func.func @transform_3(%arg0: i32) -> (i32, i32) {
    %c0_i32 = arith.constant 0 : i32
    %c0_i32_0 = arith.constant 0 : i32
    return %c0_i32, %arg0 : i32, i32
  }
  func.func @transform_4(%arg0: i32) -> (i32, i32) {
    %c0_i32 = arith.constant 0 : i32
    %c0_i32_0 = arith.constant 0 : i32
    return %c0_i32, %arg0 : i32, i32
  }
  func.func @transform_5(%arg0: i32) -> (i32, i32) {
    %c0_i32 = arith.constant 0 : i32
    %c0_i32_0 = arith.constant 0 : i32
    return %arg0, %c0_i32 : i32, i32
  }
  func.func @transform_6(%arg0: i32) -> (i32, i32) {
    %c0_i32 = arith.constant 0 : i32
    %c0_i32_0 = arith.constant 0 : i32
    %c0_i32_1 = arith.constant 0 : i32
    return %c0_i32, %c0_i32_0 : i32, i32
  }
  func.func @transform_7(%arg0: i32) -> (i32, i32) {
    %c0_i32 = arith.constant 0 : i32
    %c0_i32_0 = arith.constant 0 : i32
    %c0_i32_1 = arith.constant 0 : i32
    return %c0_i32, %c0_i32_0 : i32, i32
  }
}

</mosaic_0001>

<bundles_post_ra>
// kernel: tpu_custom_call.1
= control target key start
LH: loop header
LB: loop body
LE: loop exit
PB: predicated region body
PF: predicated region fallthrough
CT: control target
= control target key end

     0   :  { %12 = vsyncpa [#allocation4], 0  ;;  %s422_s0 = inlined_call_operand.hbm [shape: f32[8,128], index: 0, kind: input, shape index: {}]   ;;  %s423_s1 = inlined_call_operand.hbm [shape: f32[128,128], index: 1, kind: input, shape index: {}]   ;;  %s424_s2 = inlined_call_operand.vmem [shape: f32[1,128], index: 2, kind: input, shape index: {}]   ;;  %s425_s3 = inlined_call_operand.vmem [shape: f32[1,128], index: 3, kind: input, shape index: {}]   ;;  %s426_s4 = inlined_call_operand.vmem [shape: f32[1,128], index: 4, kind: input, shape index: {}]   ;;  %s427_s5 = inlined_call_operand.hbm [shape: f32[128,128], index: 5, kind: input, shape index: {}]   ;;  %s428_s6 = inlined_call_operand.vmem [shape: f32[1,128], index: 6, kind: input, shape index: {}]   ;;  %s429_s7 = inlined_call_operand.hbm [shape: f32[8,128], index: 7, kind: output, shape index: {}]  }
   0x1   :  { %13 = vsyncpa [#allocation7], 0  ;;  %s30_s26 = sshll.u32 %s423_s1, 4  ;;  %s31_s26 = int_to_ptr.hbm [resolvable:$true] %s30_s26 }
   0x2   :  { %14 = vsyncpa [#allocation5], 0  ;;  %s351_s27 = smov [#allocation6]   ;;  %s20_s8 = sshll.u32 %s422_s0, 4  ;;  %s21_s8 = int_to_ptr.hbm [resolvable:$true] %s20_s8 }
   0x3   :  { %s32_s28 = sshll.u32 %s351_s27, 4  ;;  %s352_s9 = smov 128   ;;  %s33_s28 = int_to_ptr.vmem [resolvable:$true] %s32_s28 }
   0x4   :  { %s353_s10 = smov 8   ;;  %s354_s11 = smov [#allocation3]  }
   0x5   :  { %38 = dma.hbm_to_vmem [thread:$0]  %s31_s26, 2048, %s33_s28, [#allocation7], %s352_s9, %s352_s9, %s353_s10  }
   0x6   :  { %s22_s12 = sshll.u32 %s354_s11, 4  ;;  %s49_s15 = sshll.u32 %s427_s5, 4  ;;  %s23_s12 = int_to_ptr.vmem [resolvable:$true] %s22_s12  ;;  %s50_s15 = int_to_ptr.hbm [resolvable:$true] %s49_s15 }
   0x7   :  { %25 = dma.hbm_to_vmem [thread:$0]  %s21_s8, 128, %s23_s12, [#allocation4]  }
   0x8   :  { %s355_s1 = smov [#allocation8]  }
   0x9   :  { %s51_s16 = sshll.u32 %s355_s1, 4  ;;  %s52_s16 = int_to_ptr.vmem [resolvable:$true] %s51_s16 }
   0xa   :  { %57 = dma.hbm_to_vmem [thread:$0]  %s50_s15, 2048, %s52_s16, [#allocation7], %s352_s9, %s352_s9, %s353_s10  }
   0xb   :  { %345 = dma.done.wait [#allocation4], 128  }
   0xc   :  { %346 = vsyncadd [#allocation4], 4294967168 }
   0xd   :  { %347 = dma.done.wait [#allocation7], 4096  }
   0xe   :  { %348 = vsyncadd [#allocation7], 4294963200  ;;  %v93_v0 = vld [vmem:[#allocation6 + $0x78] sm:$0xff]  ;;  %v92_v1 = vld [vmem:[#allocation6 + $0x70] sm:$0xff]  ;;  %v356_v23 = vmov 8.0   ;;  %s222_s25 = sshll.u32 %s429_s7, 4  ;;  %s223_s25 = int_to_ptr.hbm [resolvable:$true] %s222_s25 }
   0xf   :  { %98 = vmatpush.msra.mxu0 %v93_v0  ;;  %v91_v2 = vld [vmem:[#allocation6 + $0x68] sm:$0xff]  ;;  %v90_v3 = vld [vmem:[#allocation6 + $0x60] sm:$0xff]  ;;  %v89_v4 = vld [vmem:[#allocation6 + $0x58] sm:$0xff]  ;;  %243 = vrcp.f32 %v356_v23 }
  0x10   :  { %v88_v5 = vld [vmem:[#allocation6 + $0x50] sm:$0xff]  ;;  %v87_v6 = vld [vmem:[#allocation6 + $0x48] sm:$0xff]  ;;  %v86_v7 = vld [vmem:[#allocation6 + $0x40] sm:$0xff] }
  0x11   :  { %99 = vmatpush.msra.mxu0 %v92_v1  ;;  %v85_v8 = vld [vmem:[#allocation6 + $0x38] sm:$0xff]  ;;  %v84_v9 = vld [vmem:[#allocation6 + $0x30] sm:$0xff]  ;;  %v83_v10 = vld [vmem:[#allocation6 + $0x28] sm:$0xff] }
  0x12   :  { %v82_v11 = vld [vmem:[#allocation6 + $0x20] sm:$0xff]  ;;  %v81_v12 = vld [vmem:[#allocation6 + $0x18] sm:$0xff]  ;;  %v80_v13 = vld [vmem:[#allocation6 + $0x10] sm:$0xff] }
  0x13   :  { %100 = vmatpush.msra.mxu0 %v91_v2  ;;  %v79_v14 = vld [vmem:[#allocation6 + $0x8] sm:$0xff]  ;;  %v78_v15 = vld [vmem:[#allocation6] sm:$0xff]  ;;  %v77_v16 = vld [vmem:[#allocation3] sm:$0xff] }
  0x14   :  { %v178_v17 = vld [vmem:[#allocation8 + $0x78] sm:$0xff]  ;;  %v177_v18 = vld [vmem:[#allocation8 + $0x70] sm:$0xff]  ;;  %v176_v19 = vld [vmem:[#allocation8 + $0x68] sm:$0xff] }
  0x15   :  { %101 = vmatpush.msra.mxu0 %v90_v3  ;;  %179 = vmatpush.msra.mxu1 %v178_v17  ;;  %v175_v20 = vld [vmem:[#allocation8 + $0x60] sm:$0xff]  ;;  %v174_v21 = vld [vmem:[#allocation8 + $0x58] sm:$0xff]  ;;  %v173_v22 = vld [vmem:[#allocation8 + $0x50] sm:$0xff]  ;;  %v244_v26 = vpop.eup %243 }
  0x16   :  { %v172_v24 = vld [vmem:[#allocation8 + $0x48] sm:$0xff]  ;;  %v171_v25 = vld [vmem:[#allocation8 + $0x40] sm:$0xff]  ;;  %v170_v27 = vld [vmem:[#allocation8 + $0x38] sm:$0xff]  ;;  %v126_v30 = vmul.f32 8.0, %v244_v26  ;;  %vm130_vm0 = vweird.f32 %v244_v26 }
  0x17   :  { %102 = vmatpush.msra.mxu0 %v89_v4  ;;  %180 = vmatpush.msra.mxu1 %v177_v18  ;;  %v240_v28 = vld [vmem:[%s424_s2] ss:$0 sm:$0xff]  ;;  %v169_v29 = vld [vmem:[#allocation8 + $0x30] sm:$0xff]  ;;  %v168_v31 = vld [vmem:[#allocation8 + $0x28] sm:$0xff] }
  0x18   :  { %v167_v34 = vld [vmem:[#allocation8 + $0x20] sm:$0xff]  ;;  %v127_v35 = vsub.f32 1.0, %v126_v30  ;;  %v166_v37 = vld [vmem:[#allocation8 + $0x18] sm:$0xff]  ;;  %v165_v39 = vld [vmem:[#allocation8 + $0x10] sm:$0xff] }
  0x19   :  { %103 = vmatpush.msra.mxu0 %v88_v5  ;;  %181 = vmatpush.msra.mxu1 %v176_v19  ;;  %v164_v42 = vld [vmem:[#allocation8 + $0x8] sm:$0xff]  ;;  %v163_v44 = vld [vmem:[#allocation8] sm:$0xff]  ;;  %v153_v3 = vld [vmem:[%s425_s3] sm:$0x1]  ;;  %s357_s3 = smov [#allocation9]  }
  0x1a   :  { %v128_v40 = vmul.f32 %v244_v26, %v127_v35  ;;  %s220_s22 = sshll.u32 %s357_s3, 4  ;;  %s221_s22 = int_to_ptr.vmem [resolvable:$true] %s220_s22 }
  0x1b   :  { %104 = vmatpush.msra.mxu0 %v87_v6  ;;  %182 = vmatpush.msra.mxu1 %v175_v20 }
  0x1c   :  { %v129_v45 = vadd.f32 %v244_v26, %v128_v40 }
  0x1d   :  { %105 = vmatpush.msra.mxu0 %v86_v7  ;;  %183 = vmatpush.msra.mxu1 %v174_v21  ;;  %v241_v7 = vld [vmem:[%s426_s4] ss:$0 sm:$0xff] }
  0x1e   :  { %v131_v48 = vsel %vm130_vm0, %v244_v26, %v129_v45 }
  0x1f   :  { %106 = vmatpush.msra.mxu0 %v85_v8  ;;  %184 = vmatpush.msra.mxu1 %v173_v22 }
  0x21   :  { %107 = vmatpush.msra.mxu0 %v84_v9  ;;  %185 = vmatpush.msra.mxu1 %v172_v24 }
  0x23   :  { %108 = vmatpush.msra.mxu0 %v83_v10  ;;  %186 = vmatpush.msra.mxu1 %v171_v25  ;;  %v242_v10 = vld [vmem:[%s428_s6] ss:$0 sm:$0xff] }
  0x25   :  { %109 = vmatpush.msra.mxu0 %v82_v11  ;;  %187 = vmatpush.msra.mxu1 %v170_v27 }
  0x27   :  { %110 = vmatpush.msra.mxu0 %v81_v12  ;;  %188 = vmatpush.msra.mxu1 %v169_v29 }
  0x29   :  { %111 = vmatpush.msra.mxu0 %v80_v13  ;;  %189 = vmatpush.msra.mxu1 %v168_v31 }
  0x2b   :  { %112 = vmatpush.msra.mxu0 %v79_v14  ;;  %190 = vmatpush.msra.mxu1 %v167_v34 }
  0x2d   :  { %113 = vmatpush.msra.mxu0 %v78_v15  ;;  %191 = vmatpush.msra.mxu1 %v166_v37 }
  0x2e   :  { %114 = vmatmul.f32.vlgmr.msra.gmra.mxu0 %v77_v16 }
  0x2f   :  { %192 = vmatpush.msra.mxu1 %v165_v39 }
  0x31   :  { %193 = vmatpush.msra.mxu1 %v164_v42 }
  0x33   :  { %194 = vmatpush.msra.mxu1 %v163_v44 }
  0xab   :  { %v115_v32 = vpop.f32.mrf.mxu0 }
  0xac   :  { %v116_v33 = vadd.f32 %v240_v28, %v115_v32 }
  0xae   :  { %v118_v36 = vmax.f32 %v116_v33, 0.0 }
  0xb0   :  { %v119_v38 = vrot.slane %v118_v36, 4 }
  0xb2   :  { %v120_v41 = vadd.f32 %v119_v38, %v118_v36 }
  0xb4   :  { %v121_v43 = vrot.slane %v120_v41, 2 }
  0xb6   :  { %v122_v46 = vadd.f32 %v121_v43, %v120_v41 }
  0xb8   :  { %v123_v47 = vrot.slane %v122_v46, 1 }
  0xba   :  { %v124_v49 = vadd.f32 %v123_v47, %v122_v46 }
  0xbc   :  { %v132_v50 = vmul.f32 %v131_v48, %v124_v49 }
  0xbe   :  { %v133_v51 = vsub.f32 %v118_v36, %v132_v50 }
  0xc0   :  { %v134_v52 = vmul.f32 %v133_v51, %v133_v51 }
  0xc2   :  { %v135_v53 = vrot.slane %v134_v52, 4 }
  0xc4   :  { %v136_v54 = vadd.f32 %v135_v53, %v134_v52 }
  0xc6   :  { %v137_v55 = vrot.slane %v136_v54, 2 }
  0xc8   :  { %v138_v56 = vadd.f32 %v137_v55, %v136_v54 }
  0xca   :  { %v139_v57 = vrot.slane %v138_v56, 1 }
  0xcc   :  { %v140_v58 = vadd.f32 %v139_v57, %v138_v56 }
  0xce   :  { %v141_v59 = vmul.f32 %v140_v58, %v131_v48 }
  0xd0   :  { %v142_v60 = vadd.f32 1e-05, %v141_v59 }
  0xd2   :  { %245 = vrsqrt.f32 %v142_v60  ;;  %vm149_vm2 = vweird.f32 %v142_v60 }
  0xd8   :  { %v246_v61 = vpop.eup %245 }
  0xd9   :  { %v144_v62 = vmul.f32 %v246_v61, %v142_v60  ;;  %vm150_vm1 = vweird.f32 %v246_v61 }
  0xda   :  { %vm151_vm3 = vmor %vm149_vm2, %vm150_vm1 }
  0xdb   :  { %v145_v63 = vmul.f32 %v246_v61, %v144_v62 }
  0xdd   :  { %v146_v0 = vmul.f32 0.5, %v145_v63 }
  0xdf   :  { %v147_v1 = vsub.f32 1.5, %v146_v0 }
  0xe1   :  { %v148_v2 = vmul.f32 %v246_v61, %v147_v1 }
  0xe3   :  { %v152_v4 = vsel %vm151_vm3, %v246_v61, %v148_v2 }
  0xe4   :  { %v154_v5 = vmul.f32 %v153_v3, %v152_v4 }
  0xe6   :  { %v155_v6 = vperm.slane %v154_v5, 0 }
  0xe8   :  { %v156_v8 = vmul.f32 %v155_v6, %v133_v51 }
  0xea   :  { %v161_v9 = vadd.f32 %v241_v7, %v156_v8 }
  0xec   :  { %195 = vmatmul.f32.vlgmr.msra.gmra.mxu1 %v161_v9 }
 0x169   :  { %v196_v11 = vpop.f32.mrf.mxu1 }
 0x16a   :  { %v209_v12 = vadd.f32 %v242_v10, %v196_v11 }
 0x16c   :  { %v210_v13 = vmul.f32 0.5, %v209_v12 }
 0x16e   :  { %247 = vtanh.f32 %v210_v13 }
 0x174   :  { %v248_v14 = vpop.eup %247 }
 0x175   :  { %v212_v15 = vadd.f32 1.0, %v248_v14 }
 0x177   :  { %v213_v16 = vmul.f32 0.5, %v212_v15 }
 0x179   :  { %214 = vst [vmem:[#allocation9] sm:$0xff] %v213_v16 }
 0x17a   :  { %225 = dma.vmem_to_hbm [thread:$0]  %s221_s22, 128, %s223_s25, [#allocation5]  }
 0x17b   :  { %349 = dma.done.wait [#allocation5], 128  }
 0x17c   :  { %350 = vsyncadd [#allocation5], 4294967168 }
 0x17d   :  { %230 = vsyncpa [#allocation4], 1 }
 0x17e   :  { %231 = vsyncpa [#allocation7], 1 }
 0x17f   :  { %232 = vsyncpa [#allocation5], 1 }

</bundles_post_ra>
